<compile_context>
chip_gen: v7x
topology: tpu7x:2x2x1
jax: 0.10.0
libtpu: 0.0.40
codegen_flags: <defaults>
</compile_context>

<pallas_src>
import jax
import jax.numpy as jnp
from jax.experimental import pallas as pl
from jax.experimental.pallas import tpu as pltpu

BN_EPS = 1e-5


def _conv_stats_kernel(xcol_ref, w_ref, y_ref, stats_ref):
    """One (batch n, M-tile m) grid step: big-K conv matmul + streaming BN stats.

    xcol_ref:  (1, K, TM)    im2col slab tile (K = 27*Cin), M on lanes
    w_ref:     (Cp, K)       reshaped conv weights (resident across the grid)
    y_ref:     (1, Cp, TM)   conv output tile, lane-dense
    stats_ref: (1, Cp, 2)    per-batch running [sum, sum_sq] per channel
                             (resident across the M-tile axis)
    """
    m = pl.program_id(1)

    @pl.when(m == 0)
    def _init():
        stats_ref[...] = jnp.zeros_like(stats_ref)

    # Single MXU matmul with K = 27*Cin contraction depth: (Cp, K) @ (K, TM).
    y = jnp.dot(w_ref[...], xcol_ref[0], preferred_element_type=jnp.float32)
    y_ref[0] = y

    s = jnp.sum(y, axis=1, keepdims=True)        # (Cp, 1)
    ss = jnp.sum(y * y, axis=1, keepdims=True)   # (Cp, 1)
    stats_ref[0] += jnp.concatenate([s, ss], axis=1)


def _bn_relu_kernel(y_ref, ss_ref, o_ref):
    """Per-channel FMA (folded BatchNorm) + ReLU on a lane-dense tile."""
    scale = ss_ref[:, 0:1]   # (Cp, 1)
    shift = ss_ref[:, 1:2]   # (Cp, 1)
    o_ref[0] = jnp.maximum(y_ref[0] * scale + shift, 0.0).astype(o_ref.dtype)


def single_conv_forward(x_ncdhw, w_oidhw, b, gamma, beta, *, tile_m=256):
    """Equivalent of SingleConv(in_ch, out_ch)(x) with x in NCDHW (train-mode BN)."""
    del b  # Conv bias is exactly cancelled by training-mode BatchNorm.
    N, Cin, D, H, W = x_ncdhw.shape
    Cout = w_oidhw.shape[0]
    M = D * H * W
    K = 27 * Cin

    # Pad channels to a sublane multiple, spatial M to a lane-tile multiple.
    Cp = ((Cout + 7) // 8) * 8
    TM = min(tile_m, ((M + 127) // 128) * 128)
    Mp = ((M + TM - 1) // TM) * TM

    xf = x_ncdhw.astype(jnp.float32)
    # --- im2col (HBM layout plumbing, done once by XLA) ------------------
    x_pad = jnp.pad(xf, ((0, 0), (0, 0), (1, 1), (1, 1), (1, 1)))
    taps = []
    for kd in range(3):
        for kh in range(3):
            for kw in range(3):
                taps.append(x_pad[:, :, kd:kd + D, kh:kh + H, kw:kw + W])
    xcol = jnp.stack(taps, axis=1).reshape(N, K, M)        # tap-major, cin-minor K
    if Mp != M:
        # Zero columns contribute exactly 0 to conv output and BN stats.
        xcol = jnp.pad(xcol, ((0, 0), (0, 0), (0, Mp - M)))

    # (Cout, Cin, 3,3,3) -> (Cp, 27*Cin) matching the K ordering above.
    w2 = jnp.transpose(w_oidhw.astype(jnp.float32), (0, 2, 3, 4, 1)).reshape(Cout, K)
    if Cp != Cout:
        w2 = jnp.pad(w2, ((0, Cp - Cout), (0, 0)))

    grid = (N, Mp // TM)

    # --- pass 1: conv matmul + streaming per-channel stats ----------------
    y, stats = pl.pallas_call(
        _conv_stats_kernel,
        grid=grid,
        in_specs=[
            pl.BlockSpec((1, K, TM), lambda n, m: (n, 0, m)),
            pl.BlockSpec((Cp, K), lambda n, m: (0, 0)),
        ],
        out_specs=(
            pl.BlockSpec((1, Cp, TM), lambda n, m: (n, 0, m)),
            pl.BlockSpec((1, Cp, 2), lambda n, m: (n, 0, 0)),
        ),
        out_shape=(
            jax.ShapeDtypeStruct((N, Cp, Mp), jnp.float32),
            jax.ShapeDtypeStruct((N, Cp, 2), jnp.float32),
        ),
        compiler_params=pltpu.CompilerParams(
            dimension_semantics=("parallel", "arbitrary")),
    )(xcol, w2)

    # --- fold BatchNorm (batch statistics, biased variance) ---------------
    count = jnp.float32(N * M)
    sums = jnp.sum(stats, axis=0)                        # (Cp, 2)
    mean = sums[:, 0] / count
    var = jnp.maximum(sums[:, 1] / count - mean * mean, 0.0)
    gamma_p = jnp.pad(gamma.astype(jnp.float32), (0, Cp - Cout), constant_values=1.0)
    beta_p = jnp.pad(beta.astype(jnp.float32), (0, Cp - Cout))
    scale = gamma_p * jax.lax.rsqrt(var + BN_EPS)
    shift = beta_p - mean * scale
    scaleshift = jnp.stack([scale, shift], axis=1)       # (Cp, 2)

    # --- pass 2: per-channel FMA + ReLU ------------------------------------
    z = pl.pallas_call(
        _bn_relu_kernel,
        grid=grid,
        in_specs=[
            pl.BlockSpec((1, Cp, TM), lambda n, m: (n, 0, m)),
            pl.BlockSpec((Cp, 2), lambda n, m: (0, 0)),
        ],
        out_specs=pl.BlockSpec((1, Cp, TM), lambda n, m: (n, 0, m)),
        out_shape=jax.ShapeDtypeStruct((N, Cp, Mp), x_ncdhw.dtype),
        compiler_params=pltpu.CompilerParams(
            dimension_semantics=("parallel", "parallel")),
    )(y, scaleshift)

    # (N, Cp, Mp) -> (N, Cout, D, H, W): lane-dense layout IS NCDHW after reshape.
    return z[:, :Cout, :M].reshape(N, Cout, D, H, W)


def reference(x, w, b, gamma, beta):
    """Pure-JAX reference of the PyTorch forward (train-mode BN)."""
    y = jax.lax.conv_general_dilated(
        x, w, window_strides=(1, 1, 1),
        padding=((1, 1), (1, 1), (1, 1)),
        dimension_numbers=('NCDHW', 'OIDHW', 'NCDHW'))
    y = y + b.reshape(1, -1, 1, 1, 1)
    mean = jnp.mean(y, axis=(0, 2, 3, 4), keepdims=True)
    var = jnp.mean(jnp.square(y - mean), axis=(0, 2, 3, 4), keepdims=True)
    yhat = (y - mean) / jnp.sqrt(var + BN_EPS)
    z = yhat * gamma.reshape(1, -1, 1, 1, 1) + beta.reshape(1, -1, 1, 1, 1)
    return jnp.maximum(z, 0.0)


if __name__ == "__main__":
    N, Cin, Cout, D, H, W = 2, 4, 8, 8, 8, 8

    key = jax.random.PRNGKey(0)
    k1, k2, k3, k4, k5 = jax.random.split(key, 5)

    x = jax.random.normal(k1, (N, Cin, D, H, W), jnp.float32)
    fan_in = Cin * 3 * 3 * 3
    w = jax.random.normal(k2, (Cout, Cin, 3, 3, 3), jnp.float32) / jnp.sqrt(fan_in)
    b = 0.1 * jax.random.normal(k3, (Cout,), jnp.float32)
    gamma = 1.0 + 0.1 * jax.random.normal(k4, (Cout,), jnp.float32)
    beta = 0.1 * jax.random.normal(k5, (Cout,), jnp.float32)

    out = single_conv_forward(x, w, b, gamma, beta)
    out = jax.block_until_ready(out)

    ref = reference(x, w, b, gamma, beta)
    assert out.shape == ref.shape == (N, Cout, D, H, W)
    max_err = float(jnp.max(jnp.abs(out - ref)))
    assert max_err < 5e-2, f"max abs err {max_err}"

    print("KERNEL_OK")
</pallas_src>

<mosaic_0001>
module attributes {stable_mosaic.version = 11 : i64} {
  func.func @_conv_stats_kernel(%arg0: i32, %arg1: i32, %arg2: memref<1x108x256xf32, #tpu.memory_space<vmem>>, %arg3: memref<8x108xf32, #tpu.memory_space<vmem>>, %arg4: memref<1x8x256xf32, #tpu.memory_space<vmem>>, %arg5: memref<1x8x2xf32, #tpu.memory_space<vmem>>) attributes {dimension_semantics = [#tpu.dimension_semantics<parallel>, #tpu.dimension_semantics<arbitrary>], iteration_bounds = array<i64: 2, 2>, scalar_prefetch = 0 : i64, scratch_operands = 0 : i64, tpu.core_type = #tpu.core_type<tc>, window_params = [{transform_indices = @transform_0, window_bounds = array<i64: 1, 108, 256>}, {pipeline_mode = #tpu.pipeline_mode<synchronous>, transform_indices = @transform_1, window_bounds = array<i64: 8, 108>}, {transform_indices = @transform_2, window_bounds = array<i64: 1, 8, 256>}, {transform_indices = @transform_3, window_bounds = array<i64: 1, 8, 2>}]} {
    %c0_i32 = arith.constant 0 : i32
    %0 = arith.cmpi eq, %arg1, %c0_i32 : i32
    %1 = arith.extui %0 : i1 to i32
    %c0_i32_0 = arith.constant 0 : i32
    %2 = arith.cmpi ne, %1, %c0_i32_0 : i32
    scf.if %2 {
      %cst_16 = arith.constant 0.000000e+00 : f32
      %22 = vector.broadcast %cst_16 : f32 to vector<1x8x2xf32>
      %c0_17 = arith.constant 0 : index
      %c0_18 = arith.constant 0 : index
      %c0_19 = arith.constant 0 : index
      %23 = vector.load %arg5[%c0_17, %c0_18, %c0_19] : memref<1x8x2xf32, #tpu.memory_space<vmem>>, vector<1x8x2xf32>
      tpu.vector_store %arg5[%c0_17, %c0_18, %c0_19], %22 {strides = array<i32>} : memref<1x8x2xf32, #tpu.memory_space<vmem>>, vector<1x8x2xf32>,
    } else {
    }
    %c0 = arith.constant 0 : index
    %c0_1 = arith.constant 0 : index
    %3 = vector.load %arg3[%c0, %c0_1] : memref<8x108xf32, #tpu.memory_space<vmem>>, vector<8x108xf32>
    %c0_2 = arith.constant 0 : index
    %c0_3 = arith.constant 0 : index
    %c0_4 = arith.constant 0 : index
    %4 = vector.load %arg2[%c0_2, %c0_3, %c0_4] : memref<1x108x256xf32, #tpu.memory_space<vmem>>, vector<1x108x256xf32>
    %5 = vector.shape_cast %4 : vector<1x108x256xf32> to vector<108x256xf32>
    %cst = arith.constant dense<0.000000e+00> : vector<8x256xf32>
    %6 = tpu.matmul %3, %5, %cst {dimension_numbers = #tpu.dot_dimension_numbers<[1], [0], [0], [1], [0, 0, 1, 1], [], []>} : vector<8x108xf32>, vector<108x256xf32>, vector<8x256xf32> -> vector<8x256xf32>
    %c0_5 = arith.constant 0 : index
    %c0_6 = arith.constant 0 : index
    %c0_7 = arith.constant 0 : index
    %7 = vector.load %arg4[%c0_5, %c0_6, %c0_7] : memref<1x8x256xf32, #tpu.memory_space<vmem>>, vector<1x8x256xf32>
    %8 = vector.shape_cast %7 : vector<1x8x256xf32> to vector<8x256xf32>
    %9 = vector.shape_cast %6 : vector<8x256xf32> to vector<1x8x256xf32>
    tpu.vector_store %arg4[%c0_5, %c0_6, %c0_7], %9 {strides = array<i32>} : memref<1x8x256xf32, #tpu.memory_space<vmem>>, vector<1x8x256xf32>,
    %cst_8 = arith.constant dense<0.000000e+00> : vector<8xf32>
    %10 = vector.multi_reduction <add>, %6, %cst_8 [1] : vector<8x256xf32> to vector<8xf32>
    %11 = vector.shape_cast %10 : vector<8xf32> to vector<8x1xf32>
    %12 = arith.mulf %6, %6 : vector<8x256xf32>
    %cst_9 = arith.constant dense<0.000000e+00> : vector<8xf32>
    %13 = vector.multi_reduction <add>, %12, %cst_9 [1] : vector<8x256xf32> to vector<8xf32>
    %14 = vector.shape_cast %13 : vector<8xf32> to vector<8x1xf32>
    %c0_10 = arith.constant 0 : index
    %c0_11 = arith.constant 0 : index
    %c0_12 = arith.constant 0 : index
    %15 = vector.load %arg5[%c0_10, %c0_11, %c0_12] : memref<1x8x2xf32, #tpu.memory_space<vmem>>, vector<1x8x2xf32>
    %16 = vector.shape_cast %15 : vector<1x8x2xf32> to vector<8x2xf32>
    %17 = tpu.concatenate %11, %14 in 1 : vector<8x1xf32>, vector<8x1xf32> -> vector<8x2xf32>
    %18 = arith.addf %16, %17 : vector<8x2xf32>
    %c0_13 = arith.constant 0 : index
    %c0_14 = arith.constant 0 : index
    %c0_15 = arith.constant 0 : index
    %19 = vector.load %arg5[%c0_13, %c0_14, %c0_15] : memref<1x8x2xf32, #tpu.memory_space<vmem>>, vector<1x8x2xf32>
    %20 = vector.shape_cast %19 : vector<1x8x2xf32> to vector<8x2xf32>
    %21 = vector.shape_cast %18 : vector<8x2xf32> to vector<1x8x2xf32>
    tpu.vector_store %arg5[%c0_13, %c0_14, %c0_15], %21 {strides = array<i32>} : memref<1x8x2xf32, #tpu.memory_space<vmem>>, vector<1x8x2xf32>,
    return
  }
  func.func @transform_0(%arg0: i32, %arg1: i32) -> (i32, i32, i32) {
    %c0_i32 = arith.constant 0 : i32
    %c0_i32_0 = arith.constant 0 : i32
    return %arg0, %c0_i32, %arg1 : i32, i32, i32
  }
  func.func @transform_1(%arg0: i32, %arg1: i32) -> (i32, i32) {
    %c0_i32 = arith.constant 0 : i32
    %c0_i32_0 = arith.constant 0 : i32
    %c0_i32_1 = arith.constant 0 : i32
    return %c0_i32, %c0_i32_0 : i32, i32
  }
  func.func @transform_2(%arg0: i32, %arg1: i32) -> (i32, i32, i32) {
    %c0_i32 = arith.constant 0 : i32
    %c0_i32_0 = arith.constant 0 : i32
    return %arg0, %c0_i32, %arg1 : i32, i32, i32
  }
  func.func @transform_3(%arg0: i32, %arg1: i32) -> (i32, i32, i32) {
    %c0_i32 = arith.constant 0 : i32
    %c0_i32_0 = arith.constant 0 : i32
    %c0_i32_1 = arith.constant 0 : i32
    return %arg0, %c0_i32, %c0_i32_0 : i32, i32, i32
  }
}

</mosaic_0001>

<bundles_post_ra>
// kernel: tpu_custom_call.1
= control target key start
LH: loop header
LB: loop body
LE: loop exit
PB: predicated region body
PF: predicated region fallthrough
CT: control target
= control target key end

     0   :  { %s1035_s0 = inlined_call_operand.vmem [shape: f32[2,108,512], index: 0, kind: input, shape index: {}]   ;;  %s1036_s1 = inlined_call_operand.vmem [shape: f32[8,108], index: 1, kind: input, shape index: {}]   ;;  %s1037_s2 = inlined_call_operand.hbm [shape: f32[2,8,512], index: 2, kind: output, shape index: {0}]   ;;  %s1038_s3 = inlined_call_operand.vmem [shape: f32[2,8,2], index: 3, kind: output, shape index: {1}]  }
   0x1   :  { %1039 = sst [smem:[#allocation6_spill]] %s1035_s0 }
   0x2   :  { %9 = vsyncpa [#allocation4], 0 }
   0x3   :  { %11 = vsyncpa [#allocation4 + $0x1], 0  ;;  %s783_s12 = smov 0   ;;  %s785_s13 = smov 0  }
   0x4   :  { %s787_s14 = smov 0   ;;  %s789_s15 = smov 0  }
   0x5   :  { %s791_s16 = smov 0   ;;  %s793_s17 = smov 0  }
   0x6   :  { %s795_s18 = smov 0   ;;  %s797_s19 = smov 0  }
   0x7 LB: > { %s537_s20 = sadd.s32 4294967295, %s757_s19   ;;  %s538_s21 = sadd.s32 4294967294, %s757_s19   ;;  %s757_s19 = sphi %s797_s19, %s17_s19   ;;  %s753_s18 = sphi %s795_s18, %s1050_s18   ;;  %s749_s17 = sphi %s793_s17, %s1049_s17   ;;  %s745_s16 = sphi %s791_s16, %s1048_s16   ;;  %s741_s15 = sphi %s789_s15, %s1047_s15   ;;  %s737_s14 = sphi %s787_s14, %s1046_s14   ;;  %s733_s13 = sphi %s785_s13, %s1045_s13   ;;  %s729_s12 = sphi %s783_s12, %s1044_s12  }
   0x8   : > { %s26_s22 = sadd.s32 1, %s749_s17  ;;  %s29_s23 = sadd.s32 1, %s753_s18 }
   0x9   : > { %p27_p0 = scmp.ge.s32.totalorder %s26_s22, 2  ;;  %p45_p1 = scmp.ne.s32.totalorder %s737_s14, %s733_s13 }
   0xa   : > { %p46_p2 = scmp.eq.s32.totalorder %s757_s19, 0  ;;  %p98_p5 = scmp.eq.s32.totalorder %s537_s20, 3 }
   0xb   : > { %s1052_s22 = smov (%p27_p0, %s26_s22), 0  ;;  %s1054_s23 = smov (!%p27_p0, %s29_s23), %s753_s18 }
   0xc   : > { %s34_s24 = ssub.s32 %s749_s17, %s1052_s22  ;;  %p835_p3 = por %p46_p2, %p45_p1 }
   0xd   : > { %p31_p4 = scmp.ge.s32.totalorder %s1054_s23, 2  ;;  %p103_p6 = scmp.ne.s32.totalorder %s733_s13, %s729_s12 }
   0xe   : > { %p104_p7 = scmp.eq.s32.totalorder %s538_s21, 3  ;;  %p843_p8 = por %p98_p5, %p45_p1 }
   0xf   : > { %s1056_s23 = smov (%p31_p4, %s1054_s23), 0  ;;  %s38_s30 = sadd.s32 1, %s737_s14 }
  0x10   : > { %p847_p9 = por %p104_p7, %p103_p6  ;;  %s33_s28 = ssub.s32 %s753_s18, %s1056_s23 }
  0x11   : > { %s35_s29 = sor.u32 %s34_s24, %s33_s28  ;;  %p540_p11 = scmp.ge.s32.totalorder %s757_s19, 4 }
  0x12   : > { %p36_p10 = scmp.eq.s32.totalorder %s35_s29, 0 }
  0x13   : > { %149 = sbr.rel (%p540_p11) target bundleno = 50 (0x32), region = 20 }
  0x14   : > { %s855_s4 = scalar_select %p36_p10, %s737_s14, %s38_s30  }
  0x1a   : > { %152 = sbr.rel (!%p835_p3) target bundleno = 50 (0x32), region = 24  ;;  %s154_s5 = sand.u32 (%p835_p3), 1, %s737_s14  }
  0x1b   : > { %s586_s6 = smul.u32 (%p835_p3), 224, %s154_s5  ;;  %s541_s7 = sshll.u32 (%p835_p3), %s749_s17, 1 }
  0x1c   : > { %s587_s8 = smul.u32 (%p835_p3), 56, %s753_s18  ;;  %s1043_s0 = sld [smem:[#allocation6_spill]] (%p835_p3) }
  0x1d   : > { %s871_s24 = scalar_lea.vmem (%p835_p3), [#allocation2], %s586_s6 }
  0x1e   : > { %s159_s9 = sadd.s32 (%p835_p3), %s587_s8, %s541_s7 }
  0x1f   : > { %s542_s10 = sshll.u32 (%p835_p3), %s159_s9, 3 }
  0x22   : > { %s866_s21 = scalar_lea.vmem %s1043_s0, %s542_s10 }
  0x23   : > { %v174_v0 = vld [vmem:[%s866_s21] sm:$0xff]  ;;  %v176_v1 = vld [vmem:[%s866_s21 + $0x8] sm:$0xff] }
  0x24   : > { %v178_v2 = vld [vmem:[%s866_s21 + $0x20] sm:$0xff]  ;;  %175 = vst [vmem:[%s871_s24] sm:$0xff] %v174_v0  ;;  %177 = vst [vmem:[%s871_s24 + $0x8] sm:$0xff] %v176_v1  ;;  %v180_v3 = vld [vmem:[%s866_s21 + $0x28] sm:$0xff] }
  0x25   : > { %179 = vst [vmem:[%s871_s24 + $0x10] sm:$0xff] %v178_v2  ;;  %v182_v4 = vld [vmem:[%s866_s21 + $0x40] sm:$0xff]  ;;  %v184_v5 = vld [vmem:[%s866_s21 + $0x48] sm:$0xff]  ;;  %181 = vst [vmem:[%s871_s24 + $0x18] sm:$0xff] %v180_v3 }
  0x26   : > { %183 = vst [vmem:[%s871_s24 + $0x20] sm:$0xff] %v182_v4  ;;  %185 = vst [vmem:[%s871_s24 + $0x28] sm:$0xff] %v184_v5  ;;  %v186_v6 = vld [vmem:[%s866_s21 + $0x60] sm:$0xff]  ;;  %v188_v7 = vld [vmem:[%s866_s21 + $0x68] sm:$0xff] }
  0x27   : > { %v190_v8 = vld [vmem:[%s866_s21 + $0x80] sm:$0xff]  ;;  %187 = vst [vmem:[%s871_s24 + $0x30] sm:$0xff] %v186_v6  ;;  %189 = vst [vmem:[%s871_s24 + $0x38] sm:$0xff] %v188_v7  ;;  %v192_v9 = vld [vmem:[%s866_s21 + $0x88] sm:$0xff] }
  0x28   : > { %191 = vst [vmem:[%s871_s24 + $0x40] sm:$0xff] %v190_v8  ;;  %v194_v10 = vld [vmem:[%s866_s21 + $0xa0] sm:$0xff]  ;;  %v196_v11 = vld [vmem:[%s866_s21 + $0xa8] sm:$0xff]  ;;  %193 = vst [vmem:[%s871_s24 + $0x48] sm:$0xff] %v192_v9 }
  0x29   : > { %195 = vst [vmem:[%s871_s24 + $0x50] sm:$0xff] %v194_v10  ;;  %197 = vst [vmem:[%s871_s24 + $0x58] sm:$0xff] %v196_v11  ;;  %v198_v12 = vld [vmem:[%s866_s21 + $0xc0] sm:$0xff]  ;;  %v200_v13 = vld [vmem:[%s866_s21 + $0xc8] sm:$0xff] }
  0x2a   : > { %v202_v14 = vld [vmem:[%s866_s21 + $0xe0] sm:$0xff]  ;;  %199 = vst [vmem:[%s871_s24 + $0x60] sm:$0xff] %v198_v12  ;;  %201 = vst [vmem:[%s871_s24 + $0x68] sm:$0xff] %v200_v13  ;;  %v204_v15 = vld [vmem:[%s866_s21 + $0xe8] sm:$0xff] }
  0x2b   : > { %203 = vst [vmem:[%s871_s24 + $0x70] sm:$0xff] %v202_v14  ;;  %v206_v16 = vld [vmem:[%s866_s21 + $0x100] sm:$0xff]  ;;  %v208_v17 = vld [vmem:[%s866_s21 + $0x108] sm:$0xff]  ;;  %205 = vst [vmem:[%s871_s24 + $0x78] sm:$0xff] %v204_v15 }
  0x2c   : > { %207 = vst [vmem:[%s871_s24 + $0x80] sm:$0xff] %v206_v16  ;;  %209 = vst [vmem:[%s871_s24 + $0x88] sm:$0xff] %v208_v17  ;;  %v210_v18 = vld [vmem:[%s866_s21 + $0x120] sm:$0xff]  ;;  %v212_v19 = vld [vmem:[%s866_s21 + $0x128] sm:$0xff] }
  0x2d   : > { %v214_v20 = vld [vmem:[%s866_s21 + $0x140] sm:$0xff]  ;;  %211 = vst [vmem:[%s871_s24 + $0x90] sm:$0xff] %v210_v18  ;;  %213 = vst [vmem:[%s871_s24 + $0x98] sm:$0xff] %v212_v19  ;;  %v216_v21 = vld [vmem:[%s866_s21 + $0x148] sm:$0xff] }
  0x2e   : > { %215 = vst [vmem:[%s871_s24 + $0xa0] sm:$0xff] %v214_v20  ;;  %v218_v22 = vld [vmem:[%s866_s21 + $0x160] sm:$0xff]  ;;  %v220_v23 = vld [vmem:[%s866_s21 + $0x168] sm:$0xff]  ;;  %217 = vst [vmem:[%s871_s24 + $0xa8] sm:$0xff] %v216_v21 }
  0x2f   : > { %219 = vst [vmem:[%s871_s24 + $0xb0] sm:$0xff] %v218_v22  ;;  %221 = vst [vmem:[%s871_s24 + $0xb8] sm:$0xff] %v220_v23  ;;  %v222_v24 = vld [vmem:[%s866_s21 + $0x180] sm:$0xff]  ;;  %v224_v25 = vld [vmem:[%s866_s21 + $0x188] sm:$0xff] }
  0x30   : > { %v226_v26 = vld [vmem:[%s866_s21 + $0x1a0] sm:$0xff]  ;;  %223 = vst [vmem:[%s871_s24 + $0xc0] sm:$0xff] %v222_v24  ;;  %225 = vst [vmem:[%s871_s24 + $0xc8] sm:$0xff] %v224_v25  ;;  %v228_v27 = vld [vmem:[%s866_s21 + $0x1a8] sm:$0xff] }
  0x31   : > { %227 = vst [vmem:[%s871_s24 + $0xd0] sm:$0xff] %v226_v26  ;;  %229 = vst [vmem:[%s871_s24 + $0xd8] sm:$0xff] %v228_v27 }
  0x32 PF: > { %p543_p12 = scmp.ge.s32.totalorder %s757_s19, 1  ;;  %p234_p13 = scmp.lt.s32.totalorder %s757_s19, 5 }
  0x34   : > { %p235_p0 = pnand %p543_p12, %p234_p13 }
  0x35   : > { %s929_s25 = sand.u32 (!%p235_p0), 1, %s733_s13   ;;  %p270_p1 = scmp.lt.s32.totalorder (!%p235_p0), %s745_s16, 1 }
  0x36   : > { %238 = sbr.rel (%p235_p0) target bundleno = 465 (0x1d1), region = 47  ;;  %s544_s29 = sshll.u32 (!%p235_p0), %s929_s25, 4 }
  0x37   : > { %s588_s28 = smul.u32 (!%p235_p0), 224, %s929_s25  ;;  %s942_s10 = scalar_lea.vmem (!%p235_p0), [#allocation3], %s544_s29 }
  0x38   : > { %p546_p2 = scmp.ne.s32.totalorder (!%p235_p0), %s741_s15, 0 }
  0x39   : > { %s940_s9 = scalar_lea.vmem (!%p235_p0), [#allocation2], %s588_s28 }
  0x3d   : > { %s271_s30 = scalar_select %p270_p1, %s745_s16, 1 }
  0x3e   : > { %277 = sbr.rel (%p546_p2) target bundleno = 69 (0x45), region = 55  ;;  %vm278_vm0 = vcmask (!%p546_p2), 15360   ;;  %v759_v28 = vmov (!%p546_p2), 0.0  }
  0x3f   : > { %s545_s5 = sshll.u32 %s271_s30, 3 }
  0x40   : > { %s938_s8 = scalar_lea.vmem %s1038_s3, %s545_s5 }
  0x41   : > { %279 = vst.msk [vmem:[%s938_s8] sm:$0xff] (!%p546_p2), %vm278_vm0, %v759_v28 }
  0x45 PF: > { %v282_v29 = vld [vmem:[%s940_s9 + $0x8] sm:$0xff]  ;;  %v284_v30 = vld [vmem:[%s940_s9 + $0x18] sm:$0xff]  ;;  %v281_v31 = vld [vmem:[%s940_s9] sm:$0xff]  ;;  %v760_v36 = vmov 0.0   ;;  %vm313_vm1 = vcmask 1043456   ;;  %vm761_vm2 = vmmov 1  }
  0x46   : > { %v556_v32 = vpack.c.bf16 %v284_v30, %v282_v29  ;;  %v283_v33 = vld [vmem:[%s940_s9 + $0x10] sm:$0xff]  ;;  %v286_v34 = vld [vmem:[%s940_s9 + $0x28] sm:$0xff]  ;;  %v288_v35 = vld [vmem:[%s940_s9 + $0x38] sm:$0xff]  ;;  %384 = vmatprep.mubr.f32.mxu0 %v760_v36  ;;  %vm309_vm4 = vcmask 883712   ;;  %s551_s21 = sshll.u32 %s741_s15, 1  ;;  %s552_s24 = sshll.u32 %s745_s16, 2 }
  0x47   : > { %v558_v37 = vpack.c.bf16 %v283_v33, %v281_v31  ;;  %v560_v38 = vpack.c.bf16 %v288_v35, %v286_v34  ;;  %v285_v39 = vld [vmem:[%s940_s9 + $0x20] sm:$0xff]  ;;  %v287_v40 = vld [vmem:[%s940_s9 + $0x30] sm:$0xff]  ;;  %v290_v41 = vld [vmem:[%s940_s9 + $0x48] sm:$0xff]  ;;  %s424_s28 = sadd.s32 %s552_s24, %s551_s21  ;;  %s428_s30 = sshll.u32 %s942_s10, 4  ;;  %s429_s30 = int_to_ptr.vmem [resolvable:$true] %s428_s30 }
  0x48   : > { %557 = vmatprep.subr.bf16.mxu0 %v556_v32  ;;  %v292_v42 = vld [vmem:[%s940_s9 + $0x58] sm:$0xff]  ;;  %v562_v43 = vpack.c.bf16 %v287_v40, %v285_v39  ;;  %v289_v45 = vld [vmem:[%s940_s9 + $0x40] sm:$0xff]  ;;  %v291_v46 = vld [vmem:[%s940_s9 + $0x50] sm:$0xff]  ;;  %s553_s29 = sshll.u32 %s424_s28, 7  ;;  %s663_s11 = scalar_lea.vmem %s429_s30, 256 }
  0x49   : > { %559 = vmatpush1.bf16.msra.mxu0 %v558_v37  ;;  %v564_v44 = vpack.c.bf16 %v292_v42, %v290_v41  ;;  %v294_v47 = vld [vmem:[%s940_s9 + $0x68] sm:$0xff]  ;;  %v296_v48 = vld [vmem:[%s940_s9 + $0x78] sm:$0xff]  ;;  %v566_v49 = vpack.c.bf16 %v291_v46, %v289_v45  ;;  %v293_v51 = vld [vmem:[%s940_s9 + $0x60] sm:$0xff]  ;;  %s985_s7 = scalar_lea.hbm %s1037_s2, %s553_s29  ;;  %p664_p3 = scmp.ne.s32.totalorder %s429_s30, %s663_s11 }
  0x4a   : > { %561 = vmatprep.subr.bf16.mxu0 %v560_v38  ;;  %v568_v50 = vpack.c.bf16 %v296_v48, %v294_v47  ;;  %v295_v52 = vld [vmem:[%s940_s9 + $0x70] sm:$0xff]  ;;  %v298_v53 = vld [vmem:[%s940_s9 + $0x88] sm:$0xff]  ;;  %v300_v54 = vld [vmem:[%s940_s9 + $0x98] sm:$0xff]  ;;  %s762_s20 = smov [#allocation3]  }
  0x4b   : > { %v570_v55 = vpack.c.bf16 %v295_v52, %v293_v51  ;;  %v572_v56 = vpack.c.bf16 %v300_v54, %v298_v53  ;;  %v297_v57 = vld [vmem:[%s940_s9 + $0x80] sm:$0xff]  ;;  %v299_v58 = vld [vmem:[%s940_s9 + $0x90] sm:$0xff]  ;;  %v302_v59 = vld [vmem:[%s940_s9 + $0xa8] sm:$0xff]  ;;  %p665_p4 = pnand %p664_p3, %p843_p8  ;;  %s667_s0 = sshll.u32 %s762_s20, 4  ;;  %s668_s0 = int_to_ptr.vmem [resolvable:$false] %s667_s0 }
  0x4c   : > { %v304_v60 = vld [vmem:[%s940_s9 + $0xb8] sm:$0xff]  ;;  %v574_v61 = vpack.c.bf16 %v299_v58, %v297_v57  ;;  %v301_v63 = vld [vmem:[%s940_s9 + $0xa0] sm:$0xff]  ;;  %v303_v0 = vld [vmem:[%s940_s9 + $0xb0] sm:$0xff]  ;;  %s669_s15 = scalar_lea.vmem %s668_s0, 512  ;;  %p670_p6 = scmp.lt.s32.totalorder %s429_s30, %s668_s0 }
  0x4d   : > { %563 = vmatpush1.bf16.msra.mxu0 %v562_v43  ;;  %v576_v62 = vpack.c.bf16 %v304_v60, %v302_v59  ;;  %v306_v1 = vld [vmem:[%s940_s9 + $0xc8] sm:$0xff]  ;;  %v308_v2 = vld [vmem:[%s940_s9 + $0xd8] sm:$0xf]  ;;  %v578_v3 = vpack.c.bf16 %v303_v0, %v301_v63  ;;  %v305_v5 = vld [vmem:[%s940_s9 + $0xc0] sm:$0xff]  ;;  %p666_p5 = pneg %p665_p4  ;;  %p671_p7 = scmp.lt.s32.totalorder %s669_s15, %s663_s11 }
  0x4e   : > { %565 = vmatprep.subr.bf16.mxu0 %v564_v44  ;;  %v580_v4 = vpack.c.bf16 %v308_v2, %v306_v1  ;;  %v307_v6 = vld [vmem:[%s940_s9 + $0xd0] sm:$0xf]  ;;  %vm581_vm3 = vmpackc.low %vm313_vm1, %vm761_vm2  ;;  %v280_v8 = vld [vmem:[%s1036_s1] sm:$0xff]  ;;  %s408_s9 = scalar_lea.sflag [#allocation4], %s929_s25 }
  0x4f   : > { %v583_v7 = vpack.c.bf16 %v307_v6, %v305_v5  ;;  %p672_p10 = por %p671_p7, %p670_p6 }
  0x51   : > { %567 = vmatpush1.bf16.msra.mxu0 %v566_v49  ;;  %p673_p11 = pnand %p672_p10, %p666_p5 }
  0x52   : > { %569 = vmatprep.subr.bf16.mxu0 %v568_v50 }
  0x55   : > { %571 = vmatpush1.bf16.msra.mxu0 %v570_v55 }
  0x56   : > { %573 = vmatprep.subr.bf16.mxu0 %v572_v56 }
  0x59   : > { %575 = vmatpush1.bf16.msra.mxu0 %v574_v61 }
  0x5a   : > { %577 = vmatprep.subr.bf16.mxu0 %v576_v62 }
  0x5d   : > { %579 = vmatpush1.bf16.msra.mxu0 %v578_v3 }
  0x5e   : > { %582 = vmatprep.subr.msk.bf16.mxu0 %vm581_vm3, %v580_v4 }
  0x61   : > { %585 = vmatpush1.bf16.msk.msra.mxu0 %vm581_vm3, %v583_v7 }
  0x64   : > { %549 = vmatmul.mubr.msk.f32.vlgmr.msra.gmra.mrb[0].mxu0 %vm309_vm4, %v280_v8 }
 0x137   : > { %v386_v9 = vpop.f32.mrb[0].mxu0 }
 0x138   : > { %391 = vst [vmem:[%s942_s10] sm:$0xff] %v386_v9  ;;  %v388_v10 = vpop.f32.mrb[1].mxu0  ;;  %v396_v11 = vmul.f32 %v386_v9, %v386_v9 }
 0x139   : > { %392 = vst [vmem:[%s942_s10 + $0x8] sm:$0xff] %v388_v10  ;;  %v397_v12 = vmul.f32 %v388_v10, %v388_v10  ;;  %v393_v13 = vadd.f32 %v388_v10, %v386_v9 }
 0x13b   : > { %394 = vadd.xlane.f32.xlu0 %v393_v13  ;;  %v398_v14 = vadd.f32 %v397_v12, %v396_v11 }
 0x13f   : > { %399 = vadd.xlane.f32.xlu0 %v398_v14 }
 0x140   : > { %676 = shalt.err (!%p673_p11)
}
 0x141   : > { %s677_s16 = scalar_lea.hbm %s985_s7, 256  ;;  %s681_s21 = scalar_lea.hbm %s1037_s2, 1024 }
 0x142   : > { %p678_p12 = scmp.ne.s32.totalorder %s985_s7, %s677_s16  ;;  %p682_p1 = scmp.lt.u32.totalorder %s985_s7, %s1037_s2 }
 0x143   : > { %p683_p2 = scmp.lt.u32.totalorder %s681_s21, %s677_s16  ;;  %p685_p4 = scmp.lt.u32.totalorder %s677_s16, %s985_s7 }
 0x144   : > { %p679_p13 = pnand %p678_p12, %p843_p8 }
 0x145   : > { %p684_p3 = por %p683_p2, %p682_p1 }
 0x146   : > { %p680_p0 = pneg %p679_p13 }
 0x147   : > { %p686_p5 = por %p685_p4, %p684_p3 }
 0x149   : > { %p687_p6 = pnand %p686_p5, %p680_p0 }
 0x14b   : > { %690 = shalt.err (!%p687_p6)
}
 0x14c   : > { %589 = dma.vmem_to_hbm [thread:$0]  (%p843_p8), %s429_s30, 256, %s985_s7, %s408_s9   ;;  %vm402_vm5 = vcmask 7168   ;;  %v401_v16 = vld [vmem:[%s938_s8] sm:$0xff]  ;;  %vm405_vm6 = vcmask 15360  }
 0x1c8   : > { %v395_v15 = vpop.xlane.xlu0 %394 }
 0x1cc   : > { %v400_v17 = vpop.xlane.xlu0 %399 }
 0x1cd   : > { %v403_v18 = vsel %vm402_vm5, %v395_v15, %v400_v17 }
 0x1ce   : > { %v404_v19 = vadd.f32 %v403_v18, %v401_v16 }
 0x1d0   : > { %406 = vst.msk [vmem:[%s938_s8] sm:$0xff] %vm405_vm6, %v404_v19 }
 0x1d1 PF: > { %p595_p7 = scmp.ge.s32.totalorder %s757_s19, 2  ;;  %s443_s28 = sand.u32 1, %s729_s12  }
 0x1d2   : > { %s444_s26 = scalar_lea.sflag [#allocation4], %s443_s28 }
 0x1d3   : > { %p592_p10 = pnand %p595_p7, %p847_p9 }
 0x1d5   : > { %724 = dma.done.wait (!%p592_p10), %s444_s26, 256  }
 0x1d6   : > { %726 = vsyncadd (!%p592_p10), %s444_s26, 4294967040  ;;  %s17_s19 = sadd.s32 1, %s757_s19   ;;  %s1044_s12 = smov %s733_s13 }
 0x1d7   : > { %p14_p8 = scmp.ge.s32.totalorder %s17_s19, 6   ;;  %s1045_s13 = smov %s737_s14 }
 0x1d8   : > { %s1046_s14 = smov %s855_s4  ;;  %s1047_s15 = smov %s749_s17 }
 0x1d9   : > { %s1048_s16 = smov %s753_s18  ;;  %s1049_s17 = smov %s1052_s22 }
 0x1da   : > { %s1050_s18 = smov %s1056_s23  ;;  %16 = sbr.rel (!%p14_p8) target bundleno = 7 (0x7), region = 107 }
 0x1e1   :  { %456 = vsyncpa [#allocation4], 1 }
 0x1e2   :  { %458 = vsyncpa [#allocation4 + $0x1], 1 }

</bundles_post_ra>
